<compile_context>
chip_gen: v6e
topology: v6e:2x2x1
jax: 0.10.0
libtpu: 0.0.40
codegen_flags: <defaults>
</compile_context>

<pallas_src>
import functools
import math

import jax
import jax.numpy as jnp
import numpy as np
from jax.experimental import pallas as pl
from jax.experimental.pallas import tpu as pltpu


# ---------------------------------------------------------------------------
# Helpers
# ---------------------------------------------------------------------------
def _vmem_limit_bytes():
    """Scoped-VMEM limit with headroom (don't claim all of v7x's 64 MiB;
    use more than the 32 MiB default on v5e/v6e's 128 MiB parts)."""
    cap = 128 * 1024 * 1024
    try:
        cap = int(getattr(pltpu.get_tpu_info(), "vmem_capacity_bytes", cap))
    except Exception:
        pass
    return int(max(32 * 1024 * 1024,
                   min(cap - 16 * 1024 * 1024, 100 * 1024 * 1024)))


def _bf16_transcendentals_ok():
    """bf16 EUP exists on v6e/v7x; keep exp input f32 on v4/v5 parts."""
    try:
        kind = jax.devices()[0].device_kind.lower()
    except Exception:
        return True
    return not ("v4" in kind or "v5" in kind)


def _pick_tile(n, target):
    """Largest multiple-of-8 divisor of n that is <= target (or n itself)."""
    if n <= target:
        return n
    t = (target // 8) * 8
    while t >= 8:
        if n % t == 0:
            return t
        t -= 8
    return n


# ---------------------------------------------------------------------------
# Kernel 1: fused QKV projection (single fat matmul, scale pre-folded into Q).
# ---------------------------------------------------------------------------
def _qkv_proj_kernel(x_ref, w_ref, b_ref, o_ref):
    # (Tm, E) @ (E, 3E) -> (Tm, 3E); f32 accumulation, bias add in f32.
    y = jnp.dot(x_ref[...].astype(w_ref.dtype), w_ref[...],
                preferred_element_type=jnp.float32)
    o_ref[...] = (y + b_ref[...]).astype(o_ref.dtype)


# ---------------------------------------------------------------------------
# Kernel 2: flash attention (online softmax over KV tiles) with the head-merge,
# output projection, bias and residual fused into the final KV step.
# ---------------------------------------------------------------------------
def _flash_mha_kernel(q_ref, k_ref, v_ref, bias_ref, x_ref, wout_ref, bout_ref,
                      o_ref, m_sc, l_sc, acc_sc,
                      *, num_heads, exp_dtype, bias_batched, approx_recip):
    ki = pl.program_id(2)

    @pl.when(ki == 0)
    def _():
        m_sc[...] = jnp.full(m_sc.shape, -jnp.inf, dtype=m_sc.dtype)
        l_sc[...] = jnp.zeros(l_sc.shape, dtype=l_sc.dtype)
        acc_sc[...] = jnp.zeros(acc_sc.shape, dtype=acc_sc.dtype)

    q = q_ref[0]                                        # (H, Tq, D)
    k = k_ref[0]                                        # (H, Tk, D)
    v = v_ref[0]                                        # (H, Tk, D)
    bias = bias_ref[0] if bias_batched else bias_ref[...]   # (Tq, Tk)

    # Head-batched scores, f32 accumulation; additive mask bias (0 / -1e30)
    # instead of cmp+select (and Q is already pre-scaled by 1/sqrt(D)).
    s = jnp.einsum('hqd,hkd->hqk', q, k, preferred_element_type=jnp.float32)
    s = s + bias                                        # broadcast over heads

    # Online-softmax update (flash).
    m_prev = m_sc[...]
    m_new = jnp.maximum(m_prev, jnp.max(s, axis=-1, keepdims=True))
    alpha = jnp.exp(m_prev - m_new)                     # (H, Tq, 1) f32
    p = jnp.exp((s - m_new).astype(exp_dtype))          # bf16 exp on v6e/v7x
    l_sc[...] = alpha * l_sc[...] + p.astype(jnp.float32).sum(-1, keepdims=True)
    pv = jnp.einsum('hqk,hkd->hqd', p.astype(v.dtype), v,
                    preferred_element_type=jnp.float32)
    acc_sc[...] = alpha * acc_sc[...] + pv
    m_sc[...] = m_new

    @pl.when(ki == pl.num_programs(2) - 1)
    def _():
        # Normalize after the PV matmul; reciprocal uses the EUP slot in the
        # approximate (bf16) path, exact divide in the f32 path.
        ctx = acc_sc[...] * pl.reciprocal(l_sc[...], approx=approx_recip)
        ctx = ctx.astype(v.dtype)                       # (H, Tq, D)

        # Head-merge fused into the output projection: accumulate H
        # (Tq,D)@(D,E) matmuls into a single (Tq, E) f32 buffer -- no
        # (H, Tq, E) intermediate and no cross-vreg H-sum.
        out = jnp.dot(ctx[0], wout_ref[0], preferred_element_type=jnp.float32)
        for h in range(1, num_heads):
            out = out + jnp.dot(ctx[h], wout_ref[h],
                                preferred_element_type=jnp.float32)

        out = out + bout_ref[...] + x_ref[0]            # bias + residual (f32)
        o_ref[0] = out.astype(o_ref.dtype)


# ---------------------------------------------------------------------------
# Wrapper
# ---------------------------------------------------------------------------
def multi_head_attention(x, mask, w_in, b_in, w_out, b_out, num_heads,
                         compute_dtype=jnp.bfloat16, exp_dtype=None,
                         q_block=256, kv_block=256, proj_block=512):
    """Forward of MultiHeadAttention1 (eval mode, LayerNorm='none').

    x     : (B, L, E) f32
    mask  : (L, L) or (B, L, L); nonzero == masked (torch masked_fill semantics)
    w_in  : (E, 3E);  b_in: (3E,);  w_out: (E, E);  b_out: (E,)

    compute_dtype: MXU operand dtype.  bf16 operands are supported (and
    fastest) on v5e, v6e and v7x alike; accumulation, softmax statistics and
    the residual path stay in f32.
    """
    B, L, E = x.shape
    H = num_heads
    D = E // H
    scale = 1.0 / math.sqrt(D)
    vmem_limit = _vmem_limit_bytes()

    if exp_dtype is None:
        if jnp.dtype(compute_dtype) == jnp.dtype(jnp.float32):
            exp_dtype = jnp.float32
        else:
            exp_dtype = compute_dtype if _bf16_transcendentals_ok() else jnp.float32

    # ---- Host-side parameter prep (trace time; free at runtime). ----
    # Fold 1/sqrt(D) into the Q third of the input projection.
    w_in_s = jnp.concatenate([w_in[:, :E] * scale, w_in[:, E:]], axis=1)
    w_in_s = w_in_s.astype(compute_dtype)
    b_in_s = jnp.concatenate([b_in[:E] * scale, b_in[E:]]).reshape(1, 3 * E)
    b_in_s = b_in_s.astype(jnp.float32)
    w_out_h = w_out.reshape(H, D, E).astype(compute_dtype)   # rows are h-major
    b_out_2d = b_out.reshape(1, E).astype(jnp.float32)

    # ---- Kernel 1: QKV projection over the flattened (B*L, E) rows. ----
    BL = B * L
    tm = min(proj_block, BL)
    x2d = x.reshape(BL, E)
    qkv2d = pl.pallas_call(
        _qkv_proj_kernel,
        out_shape=jax.ShapeDtypeStruct((BL, 3 * E), compute_dtype),
        grid=(pl.cdiv(BL, tm),),
        in_specs=[
            pl.BlockSpec((tm, E), lambda i: (i, 0)),
            pl.BlockSpec((E, 3 * E), lambda i: (0, 0)),
            pl.BlockSpec((1, 3 * E), lambda i: (0, 0)),
        ],
        out_specs=pl.BlockSpec((tm, 3 * E), lambda i: (i, 0)),
        compiler_params=pltpu.CompilerParams(
            dimension_semantics=("parallel",),
            vmem_limit_bytes=vmem_limit),
    )(x2d, w_in_s, b_in_s)

    # XLA layout plumbing between the two kernels: split heads and move them to
    # a major axis so the attention kernel gets lane-dense (H, T, D) blocks.
    qkv = jnp.transpose(qkv2d.reshape(B, L, 3, H, D), (2, 0, 3, 1, 4))
    q, k, v = qkv[0], qkv[1], qkv[2]                    # each (B, H, L, D)

    # ---- Mask -> additive bias (0 / -1e30) in bf16 (half the HBM of f32, no
    # per-head cmp+select in the kernel).  A shared (L, L) mask is streamed
    # with a constant-in-batch index map so it is never re-DMA'd per batch.
    bias = jnp.where(mask != 0, -1e30, 0.0).astype(jnp.bfloat16)

    tq = _pick_tile(L, q_block)
    tk = _pick_tile(L, kv_block)
    if bias.ndim == 2:
        bias_spec = pl.BlockSpec((tq, tk), lambda b, qi, ki: (qi, ki))
        bias_batched = False
    else:
        bias_spec = pl.BlockSpec((1, tq, tk), lambda b, qi, ki: (b, qi, ki))
        bias_batched = True

    kernel = functools.partial(
        _flash_mha_kernel,
        num_heads=H,
        exp_dtype=exp_dtype,
        bias_batched=bias_batched,
        # Exact reciprocal in the f32 path (keeps the tight f32 tolerance),
        # approximate EUP reciprocal otherwise.
        approx_recip=(jnp.dtype(compute_dtype) != jnp.dtype(jnp.float32)))

    out = pl.pallas_call(
        kernel,
        out_shape=jax.ShapeDtypeStruct((B, L, E), jnp.float32),
        grid=(B, L // tq, L // tk),
        in_specs=[
            pl.BlockSpec((1, H, tq, D), lambda b, qi, ki: (b, 0, qi, 0)),  # Q
            pl.BlockSpec((1, H, tk, D), lambda b, qi, ki: (b, 0, ki, 0)),  # K
            pl.BlockSpec((1, H, tk, D), lambda b, qi, ki: (b, 0, ki, 0)),  # V
            bias_spec,                                                     # mask bias
            pl.BlockSpec((1, tq, E), lambda b, qi, ki: (b, qi, 0)),        # residual x
            pl.BlockSpec((H, D, E), lambda b, qi, ki: (0, 0, 0)),          # W_out
            pl.BlockSpec((1, E), lambda b, qi, ki: (0, 0)),                # b_out
        ],
        out_specs=pl.BlockSpec((1, tq, E), lambda b, qi, ki: (b, qi, 0)),
        scratch_shapes=[
            pltpu.VMEM((H, tq, 1), jnp.float32),    # running row max
            pltpu.VMEM((H, tq, 1), jnp.float32),    # running denominator
            pltpu.VMEM((H, tq, D), jnp.float32),    # unnormalized context acc
        ],
        compiler_params=pltpu.CompilerParams(
            dimension_semantics=("parallel", "parallel", "arbitrary"),
            vmem_limit_bytes=vmem_limit),
    )(q, k, v, bias, x, w_out_h, b_out_2d)
    return out


# ---------------------------------------------------------------------------
# Pure-JAX reference matching the PyTorch forward (eval mode, no LayerNorm).
# ---------------------------------------------------------------------------
def reference_forward(x, mask, w_in, b_in, w_out, b_out, num_heads):
    B, L, E = x.shape
    D = E // num_heads
    qkv = jnp.matmul(x, w_in) + b_in
    q, k, v = jnp.split(qkv, 3, axis=-1)

    def heads(t):
        return t.reshape(B, L, num_heads, D).transpose(0, 2, 1, 3)

    q, k, v = heads(q), heads(k), heads(v)
    s = jnp.matmul(q, k.transpose(0, 1, 3, 2)) / math.sqrt(D)
    s = jnp.where((mask != 0)[:, None, :, :], -jnp.inf, s)
    p = jax.nn.softmax(s, axis=-1)
    ctx = jnp.matmul(p, v).transpose(0, 2, 1, 3).reshape(B, L, E)
    out = jnp.matmul(ctx, w_out) + b_out
    return out + x


if __name__ == "__main__":
    B, L, E, H = 2, 8, 32, 4

    key = jax.random.PRNGKey(0)
    k_x, k_win, k_bin, k_wout, k_bout = jax.random.split(key, 5)

    x = jax.random.normal(k_x, (B, L, E), dtype=jnp.float32)

    # Causal mask: nonzero == masked (torch masked_fill semantics).
    causal = jnp.triu(jnp.ones((L, L), dtype=jnp.int32), k=1)
    mask3d = jnp.broadcast_to(causal, (B, L, L))

    # Deterministic init following init_parameters() bounds; parameter shapes
    # match the torch module exactly.
    b1 = (1.5 / E) ** 0.5
    w_in = jax.random.uniform(k_win, (E, 3 * E), jnp.float32, -b1, b1)
    b2 = (1.0 / E) ** 0.5
    b_in = jax.random.uniform(k_bin, (3 * E,), jnp.float32, -b2, b2)
    b3 = (3.0 / E) ** 0.5
    w_out = jax.random.uniform(k_wout, (E, E), jnp.float32, -b3, b3)
    b_out = jax.random.uniform(k_bout, (E,), jnp.float32, -b3, b3)

    ref = reference_forward(x, mask3d, w_in, b_in, w_out, b_out, H)

    # f32 MXU operands, per-batch (B, L, L) mask path.
    out_f32 = multi_head_attention(x, mask3d, w_in, b_in, w_out, b_out, H,
                                   compute_dtype=jnp.float32)
    out_f32 = jax.block_until_ready(out_f32)
    np.testing.assert_allclose(np.asarray(out_f32), np.asarray(ref),
                               rtol=5e-3, atol=5e-3)

    # bf16 MXU operands (fast path on v5e *and* v6e/v7x; accumulation stays
    # f32), shared (L, L) mask path (constant-in-batch index map).
    out_bf16 = multi_head_attention(x, causal, w_in, b_in, w_out, b_out, H,
                                    compute_dtype=jnp.bfloat16)
    out_bf16 = jax.block_until_ready(out_bf16)
    np.testing.assert_allclose(np.asarray(out_bf16), np.asarray(ref),
                               rtol=5e-2, atol=5e-2)

    print("KERNEL_OK")
</pallas_src>

<mosaic_0001>
module attributes {stable_mosaic.version = 11 : i64} {
  func.func @_qkv_proj_kernel(%arg0: i32, %arg1: memref<16x32xf32, #tpu.memory_space<vmem>>, %arg2: memref<32x96xf32, #tpu.memory_space<vmem>>, %arg3: memref<1x96xf32, #tpu.memory_space<vmem>>, %arg4: memref<16x96xf32, #tpu.memory_space<vmem>>) attributes {dimension_semantics = [#tpu.dimension_semantics<parallel>], iteration_bounds = array<i64: 1>, scalar_prefetch = 0 : i64, scratch_operands = 0 : i64, tpu.core_type = #tpu.core_type<tc>, window_params = [{transform_indices = @transform_0, window_bounds = array<i64: 16, 32>}, {pipeline_mode = #tpu.pipeline_mode<synchronous>, transform_indices = @transform_1, window_bounds = array<i64: 32, 96>}, {pipeline_mode = #tpu.pipeline_mode<synchronous>, transform_indices = @transform_2, window_bounds = array<i64: 1, 96>}, {transform_indices = @transform_3, window_bounds = array<i64: 16, 96>}]} {
    %c0 = arith.constant 0 : index
    %c0_0 = arith.constant 0 : index
    %0 = vector.load %arg1[%c0, %c0_0] : memref<16x32xf32, #tpu.memory_space<vmem>>, vector<16x32xf32>
    %c0_1 = arith.constant 0 : index
    %c0_2 = arith.constant 0 : index
    %1 = vector.load %arg2[%c0_1, %c0_2] : memref<32x96xf32, #tpu.memory_space<vmem>>, vector<32x96xf32>
    %cst = arith.constant dense<0.000000e+00> : vector<16x96xf32>
    %2 = tpu.matmul %0, %1, %cst {dimension_numbers = #tpu.dot_dimension_numbers<[1], [0], [0], [1], [0, 0, 1, 1], [], []>} : vector<16x32xf32>, vector<32x96xf32>, vector<16x96xf32> -> vector<16x96xf32>
    %c0_3 = arith.constant 0 : index
    %c0_4 = arith.constant 0 : index
    %3 = vector.load %arg3[%c0_3, %c0_4] : memref<1x96xf32, #tpu.memory_space<vmem>>, vector<1x96xf32>
    %4 = vector.broadcast %3 : vector<1x96xf32> to vector<16x96xf32>
    %5 = arith.addf %2, %4 : vector<16x96xf32>
    %c0_5 = arith.constant 0 : index
    %c0_6 = arith.constant 0 : index
    %6 = vector.load %arg4[%c0_5, %c0_6] : memref<16x96xf32, #tpu.memory_space<vmem>>, vector<16x96xf32>
    tpu.vector_store %arg4[%c0_5, %c0_6], %5 {strides = array<i32>} : memref<16x96xf32, #tpu.memory_space<vmem>>, vector<16x96xf32>,
    return
  }
  func.func @transform_0(%arg0: i32) -> (i32, i32) {
    %c0_i32 = arith.constant 0 : i32
    %c0_i32_0 = arith.constant 0 : i32
    return %arg0, %c0_i32 : i32, i32
  }
  func.func @transform_1(%arg0: i32) -> (i32, i32) {
    %c0_i32 = arith.constant 0 : i32
    %c0_i32_0 = arith.constant 0 : i32
    %c0_i32_1 = arith.constant 0 : i32
    return %c0_i32, %c0_i32_0 : i32, i32
  }
  func.func @transform_2(%arg0: i32) -> (i32, i32) {
    %c0_i32 = arith.constant 0 : i32
    %c0_i32_0 = arith.constant 0 : i32
    %c0_i32_1 = arith.constant 0 : i32
    return %c0_i32, %c0_i32_0 : i32, i32
  }
  func.func @transform_3(%arg0: i32) -> (i32, i32) {
    %c0_i32 = arith.constant 0 : i32
    %c0_i32_0 = arith.constant 0 : i32
    return %arg0, %c0_i32 : i32, i32
  }
}

</mosaic_0001>

<bundles_post_ra>
// kernel: tpu_custom_call.1
= control target key start
LH: loop header
LB: loop body
LE: loop exit
PB: predicated region body
PF: predicated region fallthrough
CT: control target
= control target key end

     0   :  { %8 = vsyncpa [#allocation3], 0  ;;  %s298_s0 = inlined_call_operand.hbm [shape: f32[16,32], index: 0, kind: input, shape index: {}]   ;;  %s299_s1 = inlined_call_operand.hbm [shape: f32[32,96], index: 1, kind: input, shape index: {}]   ;;  %s300_s2 = inlined_call_operand.vmem [shape: f32[1,96], index: 2, kind: input, shape index: {}]   ;;  %s301_s3 = inlined_call_operand.hbm [shape: f32[16,96], index: 3, kind: output, shape index: {}]  }
   0x1   :  { %9 = vsyncpa [#allocation6], 0 }
   0x2   :  { %10 = vsyncpa [#allocation4], 0  ;;  %s250_s12 = smov [#allocation2]  }
   0x3   :  { %s16_s13 = sshll.u32 %s250_s12, 4  ;;  %s17_s13 = int_to_ptr.vmem [resolvable:$true] %s16_s13 }
   0x4   :  { %s192_s14 = scalar_lea.vmem %s17_s13, 256  ;;  %p197_p1 = scmp.lt.s32.totalorder %s17_s13, %s17_s13 }
   0x5   :  { %p193_p0 = scmp.ne.s32.totalorder %s17_s13, %s192_s14  ;;  %p198_p2 = scmp.lt.s32.totalorder %s192_s14, %s192_s14 }
   0x7   :  { %p199_p3 = por %p198_p2, %p197_p1 }
   0x9   :  { %p200_p4 = pnand %p199_p3, %p193_p0 }
   0xb   :  { %203 = shalt.err (!%p200_p4)
}
   0xc   :  { %s251_s15 = smov 128   ;;  %s252_s16 = smov 8  }
   0xd   :  { %22 = dma.hbm_to_vmem [thread:$0]  %s298_s0, 256, %s17_s13, [#allocation3], %s251_s15, %s251_s15, %s252_s16  }
   0xe   :  { %s253_s19 = smov [#allocation5]  }
   0xf   :  { %s28_s20 = sshll.u32 %s253_s19, 4  ;;  %s29_s20 = int_to_ptr.vmem [resolvable:$true] %s28_s20 }
  0x10   :  { %s212_s21 = scalar_lea.vmem %s29_s20, 512  ;;  %p217_p6 = scmp.lt.s32.totalorder %s29_s20, %s29_s20 }
  0x11   :  { %p213_p5 = scmp.ne.s32.totalorder %s29_s20, %s212_s21  ;;  %p218_p7 = scmp.lt.s32.totalorder %s212_s21, %s212_s21 }
  0x13   :  { %p219_p8 = por %p218_p7, %p217_p6 }
  0x15   :  { %p220_p9 = pnand %p219_p8, %p213_p5 }
  0x17   :  { %223 = shalt.err (!%p220_p9)
}
  0x18   :  { %34 = dma.hbm_to_vmem [thread:$0]  %s299_s1, 512, %s29_s20, [#allocation6], %s251_s15, %s251_s15, %s252_s16  }
  0x19   :  { %244 = dma.done.wait [#allocation3], 256  }
  0x1a   :  { %245 = vsyncadd [#allocation3], 4294967040 }
  0x1b   :  { %246 = dma.done.wait [#allocation6], 512  }
  0x1c   :  { %247 = vsyncadd [#allocation6], 4294966784  ;;  %vm56_vm0 = vcmask 261120   ;;  %v48_v0 = vld [vmem:[#allocation5 + $0x18] sm:$0xff]  ;;  %v47_v1 = vld [vmem:[#allocation5 + $0x10] sm:$0xff]  ;;  %vm138_vm1 = vcmask 785408  }
  0x1d   :  { %168 = vmatprep.subr.mxu0 %v48_v0  ;;  %v43_v2 = vld [vmem:[#allocation2] sm:$0xff]  ;;  %v46_v3 = vld [vmem:[#allocation5 + $0x8] sm:$0xff]  ;;  %v45_v4 = vld [vmem:[#allocation5] sm:$0xff]  ;;  %s254_s24 = smov [#allocation7]  }
  0x1e   :  { %169 = vmatpush3.msra.mxu0 %v48_v0  ;;  %176 = vmatprep.mubr.msk.f32.mxu0 %vm56_vm0, %v43_v2  ;;  %v44_v5 = vld [vmem:[#allocation2 + $0x8] sm:$0xff]  ;;  %v159_v6 = vld [vmem:[%s300_s2] ss:$0 sm:$0xff]  ;;  %s146_s25 = sshll.u32 %s254_s24, 4  ;;  %s147_s25 = int_to_ptr.vmem [resolvable:$true] %s146_s25 }
  0x1f   :  { %170 = vmatprep.subr.mxu0 %v47_v1  ;;  %s224_s26 = scalar_lea.vmem %s147_s25, 256  ;;  %p229_p11 = scmp.lt.s32.totalorder %s147_s25, %s147_s25 }
  0x20   :  { %171 = vmatpush3.msra.mxu0 %v47_v1  ;;  %p225_p10 = scmp.ne.s32.totalorder %s147_s25, %s224_s26  ;;  %p230_p12 = scmp.lt.s32.totalorder %s224_s26, %s224_s26 }
  0x21   :  { %172 = vmatprep.subr.mxu0 %v46_v3 }
  0x22   :  { %173 = vmatpush3.msra.mxu0 %v46_v3  ;;  %p231_p13 = por %p230_p12, %p229_p11 }
  0x23   :  { %174 = vmatprep.subr.mxu0 %v45_v4 }
  0x24   :  { %175 = vmatpush3.msra.mxu0 %v45_v4  ;;  %p232_p0 = pnand %p231_p13, %p225_p10 }
  0x25   :  { %177 = vmatmul.mubr.msk.f32.vlgmr.msra.gmra.mxu0 %vm56_vm0, %v44_v5 }
  0xe5   :  { %v178_v7 = vpop.f32.mrf.mxu0 }
  0xe6   :  { %v135_v8 = vadd.f32 %v178_v7, %v159_v6 }
  0xe7   :  { %v129_v9 = vpop.f32.mrf.mxu0 }
  0xe8   :  { %v130_v10 = vadd.f32 %v159_v6, %v129_v9  ;;  %140 = vst.msk [vmem:[#allocation7 + $0x8] sm:$0xff] %vm138_vm1, %v135_v8 }
  0xea   :  { %139 = vst.msk [vmem:[#allocation7] sm:$0xff] %vm138_vm1, %v130_v10 }
  0xeb   :  { %235 = shalt.err (!%p232_p0)
}
  0xec   :  { %152 = dma.vmem_to_hbm [thread:$0]  %s147_s25, 256, %s301_s3, [#allocation4], %s251_s15, %s251_s15, %s252_s16  }
  0xed   :  { %248 = dma.done.wait [#allocation4], 256  }
  0xee   :  { %249 = vsyncadd [#allocation4], 4294967040 }
  0xef   :  { %156 = vsyncpa [#allocation3], 1 }
  0xf0   :  { %157 = vsyncpa [#allocation6], 1 }
  0xf1   :  { %158 = vsyncpa [#allocation4], 1 }

</bundles_post_ra>
